<compile_context>
chip_gen: v7x
topology: tpu7x:2x2x1
jax: 0.10.0
libtpu: 0.0.40
codegen_flags: <defaults>
</compile_context>

<pallas_src>
import jax
import jax.numpy as jnp
from jax.experimental import pallas as pl
from jax.experimental.pallas import tpu as pltpu


def _round_up(x, m):
    return ((x + m - 1) // m) * m


def _pick_tile_b(batch, tile_b):
    """Choose the batch tile. >=2 grid steps for big batches (v7x megacore), 16-row alignment."""
    tile_b = max(16, (tile_b // 16) * 16)
    if batch <= tile_b:
        if batch >= 32:
            half = _round_up((batch + 1) // 2, 16)
            if half < batch:
                return half          # two (or more) grid steps -> both v7x TCs get work
        return batch                 # single block == full array dim (always legal)
    return tile_b


def _pred_mlp_kernel(z_ref, w1_ref, b1_ref, w2_ref, b2_ref, w3_ref, b3_ref, o_ref):
    f32 = jnp.float32
    x = z_ref[...].astype(f32)

    # Layer 1: Linear + ReLU (f32 accumulation; activations stay f32 -- MXU slack is free here)
    h = jnp.dot(x, w1_ref[...], preferred_element_type=f32) + b1_ref[...]
    h = jnp.maximum(h, 0.0)
    # Layer 2: Linear + ReLU
    h = jnp.dot(h, w2_ref[...], preferred_element_type=f32) + b2_ref[...]
    h = jnp.maximum(h, 0.0)
    # Layer 3: Linear (no activation) -> exact-width store in output dtype
    out = jnp.dot(h, w3_ref[...], preferred_element_type=f32) + b3_ref[...]
    o_ref[...] = out.astype(o_ref.dtype)


def prepare_params(params, weight_dtype=jnp.float32):
    """One-time (per parameter update) weight-side prep, hoisted out of the per-call path.

    Weights are stored as [in, out]; biases are reshaped to (1, dim) f32 rows.
    weight_dtype=jnp.bfloat16 is supported (kernel accumulates in f32 regardless).
    """
    w1, b1, w2, b2, w3, b3 = params
    return (
        w1.astype(weight_dtype),
        b1.reshape(1, -1).astype(jnp.float32),
        w2.astype(weight_dtype),
        b2.reshape(1, -1).astype(jnp.float32),
        w3.astype(weight_dtype),
        b3.reshape(1, -1).astype(jnp.float32),
    )


def vector_spr_decoder_forward(z, prepared_params, *, tile_b=1024):
    """Pallas implementation of VectorSPRDecoder.forward (the `pred` MLP): y = pred(z)."""
    w1, b1, w2, b2, w3, b3 = prepared_params
    B, latent_dim = z.shape
    hidden_dim = w1.shape[1]
    assert w1.shape == (latent_dim, hidden_dim)
    assert w2.shape == (hidden_dim, hidden_dim)
    assert w3.shape == (hidden_dim, latent_dim)

    tb = _pick_tile_b(B, tile_b)
    n_tiles = pl.cdiv(B, tb)

    return pl.pallas_call(
        _pred_mlp_kernel,
        out_shape=jax.ShapeDtypeStruct((B, latent_dim), z.dtype),
        grid=(n_tiles,),
        in_specs=[
            pl.BlockSpec((tb, latent_dim), lambda i: (i, 0)),          # z tile streams
            pl.BlockSpec((latent_dim, hidden_dim), lambda i: (0, 0)),  # w1 resident
            pl.BlockSpec((1, hidden_dim), lambda i: (0, 0)),           # b1 resident
            pl.BlockSpec((hidden_dim, hidden_dim), lambda i: (0, 0)),  # w2 resident
            pl.BlockSpec((1, hidden_dim), lambda i: (0, 0)),           # b2 resident
            pl.BlockSpec((hidden_dim, latent_dim), lambda i: (0, 0)),  # w3 resident
            pl.BlockSpec((1, latent_dim), lambda i: (0, 0)),           # b3 resident
        ],
        out_specs=pl.BlockSpec((tb, latent_dim), lambda i: (i, 0)),    # exact-width stores
        compiler_params=pltpu.CompilerParams(
            dimension_semantics=("parallel",),  # megacore sharding on v7x; no-op on v5e/v6e
        ),
    )(z, w1, b1, w2, b2, w3, b3)


def init_params(key, latent_dim, hidden_dim, dtype=jnp.float32):
    """Deterministic synthetic init for the `pred` MLP (weights stored as [in, out])."""
    ks = jax.random.split(key, 6)
    scale = 0.1
    w1 = scale * jax.random.normal(ks[0], (latent_dim, hidden_dim), dtype)
    b1 = scale * jax.random.normal(ks[1], (hidden_dim,), dtype)
    w2 = scale * jax.random.normal(ks[2], (hidden_dim, hidden_dim), dtype)
    b2 = scale * jax.random.normal(ks[3], (hidden_dim,), dtype)
    w3 = scale * jax.random.normal(ks[4], (hidden_dim, latent_dim), dtype)
    b3 = scale * jax.random.normal(ks[5], (latent_dim,), dtype)
    return (w1, b1, w2, b2, w3, b3)


def reference_forward(z, params):
    w1, b1, w2, b2, w3, b3 = params
    h = jnp.maximum(z @ w1 + b1, 0.0)
    h = jnp.maximum(h @ w2 + b2, 0.0)
    return h @ w3 + b3


if __name__ == "__main__":
    # Small shapes consistent with the module: batch=8, latent_dim=32, hidden_dim=64.
    # (action_shape only feeds `transition`, which forward() does not call.)
    # TODO(synk): `transition` path (cat(z, action) -> tran MLP) is not exercised by forward(); omitted.
    key = jax.random.PRNGKey(0)
    k_z, k_p = jax.random.split(key)

    B, latent_dim, hidden_dim = 8, 32, 64
    z = jax.random.normal(k_z, (B, latent_dim), jnp.float32)
    params = init_params(k_p, latent_dim, hidden_dim)

    prepared = prepare_params(params)          # one-time weight-side prep (hoisted)
    out = vector_spr_decoder_forward(z, prepared)
    out = jax.block_until_ready(out)

    ref = reference_forward(z, params)
    assert out.shape == (B, latent_dim)
    assert out.dtype == z.dtype
    # f32 weights + f32 activations + f32 accumulation -> tight tolerance vs f32 reference.
    assert jnp.allclose(out, ref, atol=2e-3, rtol=2e-3), "Pallas output mismatch vs reference"

    print("KERNEL_OK")
</pallas_src>

<mosaic_0001>
module attributes {stable_mosaic.version = 11 : i64} {
  func.func @_pred_mlp_kernel(%arg0: i32, %arg1: memref<8x32xf32, #tpu.memory_space<vmem>>, %arg2: memref<32x64xf32, #tpu.memory_space<vmem>>, %arg3: memref<1x64xf32, #tpu.memory_space<vmem>>, %arg4: memref<64x64xf32, #tpu.memory_space<vmem>>, %arg5: memref<1x64xf32, #tpu.memory_space<vmem>>, %arg6: memref<64x32xf32, #tpu.memory_space<vmem>>, %arg7: memref<1x32xf32, #tpu.memory_space<vmem>>, %arg8: memref<8x32xf32, #tpu.memory_space<vmem>>) attributes {dimension_semantics = [#tpu.dimension_semantics<parallel>], iteration_bounds = array<i64: 1>, scalar_prefetch = 0 : i64, scratch_operands = 0 : i64, tpu.core_type = #tpu.core_type<tc>, window_params = [{transform_indices = @transform_0, window_bounds = array<i64: 8, 32>}, {pipeline_mode = #tpu.pipeline_mode<synchronous>, transform_indices = @transform_1, window_bounds = array<i64: 32, 64>}, {pipeline_mode = #tpu.pipeline_mode<synchronous>, transform_indices = @transform_2, window_bounds = array<i64: 1, 64>}, {pipeline_mode = #tpu.pipeline_mode<synchronous>, transform_indices = @transform_3, window_bounds = array<i64: 64, 64>}, {pipeline_mode = #tpu.pipeline_mode<synchronous>, transform_indices = @transform_4, window_bounds = array<i64: 1, 64>}, {pipeline_mode = #tpu.pipeline_mode<synchronous>, transform_indices = @transform_5, window_bounds = array<i64: 64, 32>}, {pipeline_mode = #tpu.pipeline_mode<synchronous>, transform_indices = @transform_6, window_bounds = array<i64: 1, 32>}, {transform_indices = @transform_7, window_bounds = array<i64: 8, 32>}]} {
    %c0 = arith.constant 0 : index
    %c0_0 = arith.constant 0 : index
    %0 = vector.load %arg1[%c0, %c0_0] : memref<8x32xf32, #tpu.memory_space<vmem>>, vector<8x32xf32>
    %c0_1 = arith.constant 0 : index
    %c0_2 = arith.constant 0 : index
    %1 = vector.load %arg2[%c0_1, %c0_2] : memref<32x64xf32, #tpu.memory_space<vmem>>, vector<32x64xf32>
    %cst = arith.constant dense<0.000000e+00> : vector<8x64xf32>
    %2 = tpu.matmul %0, %1, %cst {dimension_numbers = #tpu.dot_dimension_numbers<[1], [0], [0], [1], [0, 0, 1, 1], [], []>} : vector<8x32xf32>, vector<32x64xf32>, vector<8x64xf32> -> vector<8x64xf32>
    %c0_3 = arith.constant 0 : index
    %c0_4 = arith.constant 0 : index
    %3 = vector.load %arg3[%c0_3, %c0_4] : memref<1x64xf32, #tpu.memory_space<vmem>>, vector<1x64xf32>
    %4 = vector.broadcast %3 : vector<1x64xf32> to vector<8x64xf32>
    %5 = arith.addf %2, %4 : vector<8x64xf32>
    %cst_5 = arith.constant 0.000000e+00 : f32
    %6 = vector.broadcast %cst_5 : f32 to vector<8x64xf32>
    %7 = arith.maximumf %5, %6 : vector<8x64xf32>
    %c0_6 = arith.constant 0 : index
    %c0_7 = arith.constant 0 : index
    %8 = vector.load %arg4[%c0_6, %c0_7] : memref<64x64xf32, #tpu.memory_space<vmem>>, vector<64x64xf32>
    %cst_8 = arith.constant dense<0.000000e+00> : vector<8x64xf32>
    %9 = tpu.matmul %7, %8, %cst_8 {dimension_numbers = #tpu.dot_dimension_numbers<[1], [0], [0], [1], [0, 0, 1, 1], [], []>} : vector<8x64xf32>, vector<64x64xf32>, vector<8x64xf32> -> vector<8x64xf32>
    %c0_9 = arith.constant 0 : index
    %c0_10 = arith.constant 0 : index
    %10 = vector.load %arg5[%c0_9, %c0_10] : memref<1x64xf32, #tpu.memory_space<vmem>>, vector<1x64xf32>
    %11 = vector.broadcast %10 : vector<1x64xf32> to vector<8x64xf32>
    %12 = arith.addf %9, %11 : vector<8x64xf32>
    %cst_11 = arith.constant 0.000000e+00 : f32
    %13 = vector.broadcast %cst_11 : f32 to vector<8x64xf32>
    %14 = arith.maximumf %12, %13 : vector<8x64xf32>
    %c0_12 = arith.constant 0 : index
    %c0_13 = arith.constant 0 : index
    %15 = vector.load %arg6[%c0_12, %c0_13] : memref<64x32xf32, #tpu.memory_space<vmem>>, vector<64x32xf32>
    %cst_14 = arith.constant dense<0.000000e+00> : vector<8x32xf32>
    %16 = tpu.matmul %14, %15, %cst_14 {dimension_numbers = #tpu.dot_dimension_numbers<[1], [0], [0], [1], [0, 0, 1, 1], [], []>} : vector<8x64xf32>, vector<64x32xf32>, vector<8x32xf32> -> vector<8x32xf32>
    %c0_15 = arith.constant 0 : index
    %c0_16 = arith.constant 0 : index
    %17 = vector.load %arg7[%c0_15, %c0_16] : memref<1x32xf32, #tpu.memory_space<vmem>>, vector<1x32xf32>
    %18 = vector.broadcast %17 : vector<1x32xf32> to vector<8x32xf32>
    %19 = arith.addf %16, %18 : vector<8x32xf32>
    %c0_17 = arith.constant 0 : index
    %c0_18 = arith.constant 0 : index
    %20 = vector.load %arg8[%c0_17, %c0_18] : memref<8x32xf32, #tpu.memory_space<vmem>>, vector<8x32xf32>
    tpu.vector_store %arg8[%c0_17, %c0_18], %19 {strides = array<i32>} : memref<8x32xf32, #tpu.memory_space<vmem>>, vector<8x32xf32>,
    return
  }
  func.func @transform_0(%arg0: i32) -> (i32, i32) {
    %c0_i32 = arith.constant 0 : i32
    %c0_i32_0 = arith.constant 0 : i32
    return %arg0, %c0_i32 : i32, i32
  }
  func.func @transform_1(%arg0: i32) -> (i32, i32) {
    %c0_i32 = arith.constant 0 : i32
    %c0_i32_0 = arith.constant 0 : i32
    %c0_i32_1 = arith.constant 0 : i32
    return %c0_i32, %c0_i32_0 : i32, i32
  }
  func.func @transform_2(%arg0: i32) -> (i32, i32) {
    %c0_i32 = arith.constant 0 : i32
    %c0_i32_0 = arith.constant 0 : i32
    %c0_i32_1 = arith.constant 0 : i32
    return %c0_i32, %c0_i32_0 : i32, i32
  }
  func.func @transform_3(%arg0: i32) -> (i32, i32) {
    %c0_i32 = arith.constant 0 : i32
    %c0_i32_0 = arith.constant 0 : i32
    %c0_i32_1 = arith.constant 0 : i32
    return %c0_i32, %c0_i32_0 : i32, i32
  }
  func.func @transform_4(%arg0: i32) -> (i32, i32) {
    %c0_i32 = arith.constant 0 : i32
    %c0_i32_0 = arith.constant 0 : i32
    %c0_i32_1 = arith.constant 0 : i32
    return %c0_i32, %c0_i32_0 : i32, i32
  }
  func.func @transform_5(%arg0: i32) -> (i32, i32) {
    %c0_i32 = arith.constant 0 : i32
    %c0_i32_0 = arith.constant 0 : i32
    %c0_i32_1 = arith.constant 0 : i32
    return %c0_i32, %c0_i32_0 : i32, i32
  }
  func.func @transform_6(%arg0: i32) -> (i32, i32) {
    %c0_i32 = arith.constant 0 : i32
    %c0_i32_0 = arith.constant 0 : i32
    %c0_i32_1 = arith.constant 0 : i32
    return %c0_i32, %c0_i32_0 : i32, i32
  }
  func.func @transform_7(%arg0: i32) -> (i32, i32) {
    %c0_i32 = arith.constant 0 : i32
    %c0_i32_0 = arith.constant 0 : i32
    return %arg0, %c0_i32 : i32, i32
  }
}

</mosaic_0001>

<bundles_post_ra>
// kernel: tpu_custom_call.1
= control target key start
LH: loop header
LB: loop body
LE: loop exit
PB: predicated region body
PF: predicated region fallthrough
CT: control target
= control target key end

     0   :  { %v443_v3 = vmov 0.0|0.0   ;;  %vm444_vm0 = vmmov 0   ;;  %v445_v6 = vmov 0.0   ;;  %s576_s0 = inlined_call_operand.vmem [shape: f32[8,32], index: 0, kind: input, shape index: {}]   ;;  %s577_s1 = inlined_call_operand.vmem [shape: f32[32,64], index: 1, kind: input, shape index: {}]   ;;  %s578_s2 = inlined_call_operand.vmem [shape: f32[1,64], index: 2, kind: input, shape index: {}]   ;;  %s579_s3 = inlined_call_operand.vmem [shape: f32[64,64], index: 3, kind: input, shape index: {}]   ;;  %s580_s4 = inlined_call_operand.vmem [shape: f32[1,64], index: 4, kind: input, shape index: {}]   ;;  %s581_s5 = inlined_call_operand.vmem [shape: f32[64,32], index: 5, kind: input, shape index: {}]   ;;  %s582_s6 = inlined_call_operand.vmem [shape: f32[1,32], index: 6, kind: input, shape index: {}]   ;;  %s583_s7 = inlined_call_operand.hbm [shape: f32[8,32], index: 7, kind: output, shape index: {}]  }
   0x1   :  { %v28_v0 = vld [vmem:[%s577_s1] sm:$0xff]  ;;  %v29_v1 = vld [vmem:[%s577_s1 + $0x8] sm:$0xff]  ;;  %v30_v2 = vld [vmem:[%s577_s1 + $0x10] sm:$0xff]  ;;  %385 = vmatprep.subr.bf16.mxu0 %v443_v3  ;;  %344 = vmatprep.mubr.msk.f32.mxu0 %vm444_vm0, %v445_v6 }
   0x2   :  { %v386_v4 = vpack.c.bf16 %v29_v1, %v28_v0  ;;  %v31_v5 = vld [vmem:[%s577_s1 + $0x18] sm:$0xff]  ;;  %v114_v7 = vld [vmem:[%s579_s3] sm:$0xff]  ;;  %391 = vmatprep.subr.bf16.mxu1 %v443_v3  ;;  %v115_v8 = vld [vmem:[%s579_s3 + $0x8] sm:$0xff]  ;;  %363 = vmatprep.mubr.msk.f32.mxu1 %vm444_vm0, %v445_v6 }
   0x3   :  { %v116_v9 = vld [vmem:[%s579_s3 + $0x10] sm:$0xff]  ;;  %v117_v10 = vld [vmem:[%s579_s3 + $0x18] sm:$0xff]  ;;  %v389_v11 = vpack.c.bf16 %v31_v5, %v30_v2  ;;  %v392_v12 = vpack.c.bf16 %v115_v8, %v114_v7 }
   0x4   :  { %387 = vmatpush3.bf16.msra.mxu0 %v386_v4 }
   0x5   :  { %388 = vmatprep.subr.bf16.mxu0 %v443_v3 }
   0x6   :  { %12 = vsyncpa [#allocation3], 0  ;;  %393 = vmatpush3.bf16.msra.mxu1 %v392_v12  ;;  %v395_v13 = vpack.c.bf16 %v117_v10, %v116_v9  ;;  %v118_v14 = vld [vmem:[%s579_s3 + $0x20] sm:$0xff]  ;;  %v119_v15 = vld [vmem:[%s579_s3 + $0x28] sm:$0xff]  ;;  %vm39_vm1 = vcmask 261120   ;;  %vm129_vm2 = vcmask 523264  }
   0x7   :  { %394 = vmatprep.subr.bf16.mxu1 %v443_v3  ;;  %v27_v16 = vld [vmem:[%s576_s0] sm:$0xff]  ;;  %v398_v17 = vpack.c.bf16 %v119_v15, %v118_v14  ;;  %v120_v18 = vld [vmem:[%s579_s3 + $0x30] sm:$0xff]  ;;  %v121_v19 = vld [vmem:[%s579_s3 + $0x38] sm:$0xff]  ;;  %s446_s21 = smov [#allocation2]  }
   0x8   :  { %390 = vmatpush3.bf16.msra.mxu0 %v389_v11  ;;  %v401_v20 = vpack.c.bf16 %v121_v19, %v120_v18  ;;  %v204_v21 = vld [vmem:[%s581_s5] sm:$0xff]  ;;  %v205_v22 = vld [vmem:[%s581_s5 + $0x8] sm:$0xff]  ;;  %v206_v23 = vld [vmem:[%s581_s5 + $0x10] sm:$0xff]  ;;  %s299_s22 = sshll.u32 %s446_s21, 4  ;;  %s300_s22 = int_to_ptr.vmem [resolvable:$true] %s299_s22 }
   0x9   :  { %403 = vmatprep.subr.bf16.mxu0 %v443_v3  ;;  %v404_v24 = vpack.c.bf16 %v205_v22, %v204_v21  ;;  %v207_v25 = vld [vmem:[%s581_s5 + $0x18] sm:$0xff]  ;;  %v208_v27 = vld [vmem:[%s581_s5 + $0x20] sm:$0xff]  ;;  %v209_v28 = vld [vmem:[%s581_s5 + $0x28] sm:$0xff]  ;;  %p424_p1 = scmp.lt.s32.totalorder %s300_s22, %s300_s22 }
   0xa   :  { %396 = vmatpush3.bf16.msra.mxu1 %v395_v13  ;;  %v407_v26 = vpack.c.bf16 %v207_v25, %v206_v23  ;;  %v410_v29 = vpack.c.bf16 %v209_v28, %v208_v27  ;;  %v307_v30 = vld [vmem:[%s578_s2] ss:$0 sm:$0xff]  ;;  %v210_v35 = vld [vmem:[%s581_s5 + $0x30] sm:$0xff]  ;;  %v211_v36 = vld [vmem:[%s581_s5 + $0x38] sm:$0xff]  ;;  %s419_s5 = scalar_lea.vmem %s300_s22, 128 }
   0xb   :  { %345 = vmatmul.mubr.msk.f32.vlgmr.msra.gmra.mrb[0].mxu0 %vm39_vm1, %v27_v16  ;;  %397 = vmatprep.subr.bf16.mxu1 %v443_v3  ;;  %v413_v37 = vpack.c.bf16 %v211_v36, %v210_v35  ;;  %v309_v38 = vld [vmem:[%s580_s4] ss:$0 sm:$0xff]  ;;  %p420_p0 = scmp.ne.s32.totalorder %s300_s22, %s419_s5  ;;  %p425_p2 = scmp.lt.s32.totalorder %s419_s5, %s419_s5 }
   0xc   :  { %382 = vmatprep.mubr.msk.f32.mxu0 %vm444_vm0, %v445_v6  ;;  %405 = vmatpush3.bf16.msra.mxu0 %v404_v24  ;;  %v311_v43 = vld [vmem:[%s582_s6] ss:$0 sm:$0xff] }
   0xd   :  { %406 = vmatprep.subr.bf16.mxu0 %v443_v3  ;;  %p426_p3 = por %p425_p2, %p424_p1 }
   0xe   :  { %399 = vmatpush3.bf16.msra.mxu1 %v398_v17 }
   0xf   :  { %400 = vmatprep.subr.bf16.mxu1 %v443_v3  ;;  %p427_p4 = pnand %p426_p3, %p420_p0 }
  0x10   :  { %408 = vmatpush3.bf16.msra.mxu0 %v407_v26 }
  0x11   :  { %409 = vmatprep.subr.bf16.mxu0 %v443_v3 }
  0x12   :  { %402 = vmatpush3.bf16.msra.mxu1 %v401_v20 }
  0x14   :  { %411 = vmatpush3.bf16.msra.mxu0 %v410_v29 }
  0x15   :  { %412 = vmatprep.subr.bf16.mxu0 %v443_v3 }
  0x18   :  { %414 = vmatpush3.bf16.msra.mxu0 %v413_v37 }
  0xde   :  { %v109_v31 = vpop.f32.mrb[0].mxu0 }
  0xdf   :  { %v110_v32 = vadd.f32 %v307_v30, %v109_v31  ;;  %v346_v33 = vpop.f32.mrb[1].mxu0 }
  0xe1   :  { %v113_v34 = vmax.f32 %v110_v32, 0.0 }
  0xe3   :  { %364 = vmatmul.mubr.msk.f32.vlgmr.msra.gmra.mrb[0].mxu1 %vm129_vm2, %v113_v34 }
 0x1b6   :  { %v199_v39 = vpop.f32.mrb[0].mxu1 }
 0x1b7   :  { %v200_v40 = vadd.f32 %v309_v38, %v199_v39  ;;  %v365_v41 = vpop.f32.mrb[1].mxu1 }
 0x1b9   :  { %v203_v42 = vmax.f32 %v200_v40, 0.0 }
 0x1bb   :  { %383 = vmatmul.mubr.msk.f32.vlgmr.msra.gmra.mrb[2].mxu0 %vm129_vm2, %v203_v42 }
 0x28e   :  { %v288_v44 = vpop.f32.mrb[2].mxu0 }
 0x28f   :  { %v289_v45 = vadd.f32 %v311_v43, %v288_v44  ;;  %v384_v46 = vpop.f32.mrb[3].mxu0 }
 0x291   :  { %292 = vst.msk [vmem:[#allocation2] sm:$0xff] %vm39_vm1, %v289_v45 }
 0x292   :  { %430 = shalt.err (!%p427_p4)
}
 0x293   :  { %s431_s24 = scalar_lea.hbm %s583_s7, 128 }
 0x294   :  { %p432_p5 = scmp.ne.s32.totalorder %s583_s7, %s431_s24  ;;  %p435_p6 = scmp.lt.u32.totalorder %s431_s24, %s583_s7 }
 0x296   :  { %p437_p7 = pnand %p435_p6, %p432_p5 }
 0x298   :  { %440 = shalt.err (!%p437_p7)
}
 0x299   :  { %302 = dma.vmem_to_hbm [thread:$0]  %s300_s22, 128, %s583_s7, [#allocation3]  }
 0x29a   :  { %441 = dma.done.wait [#allocation3], 128  }
 0x29b   :  { %442 = vsyncadd [#allocation3], 4294967168 }
 0x29c   :  { %306 = vsyncpa [#allocation3], 1 }

</bundles_post_ra>
